<compile_context>
chip_gen: v7x
topology: tpu7x:2x2x1
jax: 0.10.0
libtpu: 0.0.40
codegen_flags: <defaults>
</compile_context>

<pallas_src>
import functools

import jax
import jax.numpy as jnp
from jax.experimental import pallas as pl
from jax.experimental.pallas import tpu as pltpu

_NEG_FILL = -1e30  # masked pool positions; ReLU clamps them to 0 (exact, see below)


def _round_up(x, m):
    return ((x + m - 1) // m) * m


def _textcnn_kernel(T_used, x_ref, wconv_ref, pb_ref, fcw_ref, fcb_ref, out_ref):
    """Fused per-tap conv matmuls + ReLU/masked maxpool + linear for one batch tile.

    x_ref    : (TB, L_pad, Epad)       compute dtype (f32 or bf16)
    wconv_ref: (k_max, Epad, Fpad)     compute dtype (branches stacked along Fpad,
                                        taps beyond a branch's k are zero)
    pb_ref   : (T_used, Fpad)          f32: conv bias where pooled, -1e30 where masked
    fcw_ref  : (Fpad, Cpad)            compute dtype (pre-transposed fc weight)
    fcb_ref  : (1, Cpad)               f32
    out_ref  : (TB, Cpad)              f32
    """
    k_max = wconv_ref.shape[0]

    # Accumulated per-tap matmuls read straight from the ref: no im2col concat,
    # no extra (TB, T, k_max*E) VMEM tensor.  K = Epad (lane-aligned), N = Fpad.
    dn = (((2,), (0,)), ((), ()))
    acc = jax.lax.dot_general(x_ref[:, 0:T_used, :], wconv_ref[0],
                              dimension_numbers=dn,
                              preferred_element_type=jnp.float32)
    for j in range(1, k_max):
        acc = acc + jax.lax.dot_general(x_ref[:, j:j + T_used, :], wconv_ref[j],
                                        dimension_numbers=dn,
                                        preferred_element_type=jnp.float32)

    # Bias + pool mask are one precomputed additive term: valid positions get the conv
    # bias, masked ones get -1e30.  ReLU clamps masked entries to 0; valid ReLU outputs
    # are >= 0, so the plain max over the T axis is exactly the per-branch max-pool.
    conv = jnp.maximum(acc + pb_ref[...], 0.0)          # (TB, T_used, Fpad) f32
    pooled = jnp.max(conv, axis=1)                      # (TB, Fpad)

    # TODO(synk): dropout is identity in eval mode; no RNG mask applied.

    logits = jax.lax.dot_general(pooled.astype(fcw_ref.dtype), fcw_ref[...],
                                 dimension_numbers=(((1,), (0,)), ((), ())),
                                 preferred_element_type=jnp.float32)  # (TB, Cpad)
    out_ref[...] = (logits + fcb_ref[...]).astype(out_ref.dtype)


def textcnn_forward(x_emb, conv_params, fc_w, fc_b, kernel_sizes, *,
                    compute_dtype=jnp.float32, batch_tile=None):
    """x_emb: (B, L, E) f32; conv_params: list of (w (F,E,k), b (1,F));
    fc_w: (C, n*F); fc_b: (1, C). Returns (B, C) f32 logits."""
    B, L, E = x_emb.shape
    F = conv_params[0][0].shape[0]
    n = len(kernel_sizes)
    C = fc_w.shape[0]

    k_max = max(kernel_sizes)
    pool_ks = tuple(L - 2 * k + 2 for k in kernel_sizes)
    for k, pk in zip(kernel_sizes, pool_ks):
        assert pk >= 1, f"MaxPool1d kernel {pk} <= 0 (need L >= 2k-1, got L={L}, k={k})"
        assert (L - k + 1) < 2 * pk, "model assumes a single pool window (squeeze(-1))"
    T_used = max(pool_ks)                  # positions that survive some pool window
    L_pad = max(L, T_used + k_max - 1)     # rows read by the in-kernel tap slices

    Epad = _round_up(E, 128)               # lane-aligned tap loads / matmul K dim
    Fpad = _round_up(n * F, 128)           # lane-dense fused conv output width
    Cpad = _round_up(C, 128)               # lane-dense logits width

    # --- Fused conv weights: (F, E, k) -> (k_max, Epad, Fpad), branches along Fpad. ---
    w_conv = jnp.zeros((k_max, Epad, Fpad), jnp.float32)
    b_all = jnp.zeros((Fpad,), jnp.float32)
    for i, ((w, b), k) in enumerate(zip(conv_params, kernel_sizes)):
        wt = jnp.transpose(w, (2, 1, 0))                       # (k, E, F)
        w_conv = w_conv.at[:k, :E, i * F:(i + 1) * F].set(wt)  # zero taps beyond k
        b_all = b_all.at[i * F:(i + 1) * F].set(b.reshape(F))
    w_conv = w_conv.astype(compute_dtype)

    # --- Host-precomputed pool bias/mask (T_used, Fpad), f32. ---
    limit = jnp.zeros((Fpad,), jnp.int32)
    for i, pk in enumerate(pool_ks):
        limit = limit.at[i * F:(i + 1) * F].set(pk)
    t_idx = jnp.arange(T_used, dtype=jnp.int32)[:, None]
    pool_bias = jnp.where(t_idx < limit[None, :], b_all[None, :],
                          _NEG_FILL).astype(jnp.float32)

    # --- fc: pre-transposed, zero-padded to (Fpad, Cpad). ---
    fc_wT = jnp.zeros((Fpad, Cpad), jnp.float32)
    fc_wT = fc_wT.at[:n * F, :C].set(jnp.transpose(fc_w, (1, 0))).astype(compute_dtype)
    fc_bp = jnp.zeros((1, Cpad), jnp.float32).at[0, :C].set(fc_b.reshape(C))

    # --- Activations: pad seq/emb (zeros only hit zero taps / masked rows), cast. ---
    x = x_emb
    if L_pad > L or Epad > E:
        x = jnp.pad(x, ((0, 0), (0, L_pad - L), (0, Epad - E)))
    x = x.astype(compute_dtype)

    # --- Generation-aware VMEM budget & batch tile. ---
    try:
        vmem_cap = int(pltpu.get_tpu_info().vmem_capacity_bytes)
    except Exception:
        vmem_cap = 64 * 1024 * 1024        # conservative (v7x per-TC) fallback
    vmem_limit = min(vmem_cap - 24 * 1024 * 1024, int(0.85 * vmem_cap))
    vmem_limit = max(int(vmem_limit), 32 * 1024 * 1024)

    cbytes = jnp.dtype(compute_dtype).itemsize
    L_t = _round_up(L_pad, 8)
    T_t = _round_up(T_used, 8)

    def _tile_bytes(tb):
        x_blk = 2 * tb * L_t * Epad * cbytes          # double-buffered input tile
        conv_tmp = 2 * tb * T_t * Fpad * 4            # f32 accumulator + elementwise temp
        out_blk = 2 * tb * Cpad * 4
        w_blk = 2 * (k_max * Epad * Fpad + Fpad * Cpad) * cbytes
        misc = 2 * (T_t * Fpad + 2 * Cpad) * 4
        return x_blk + conv_tmp + out_blk + w_blk + misc

    if batch_tile is None:
        batch_tile = 256 if vmem_cap >= 96 * 1024 * 1024 else 128
    TB = max(8, _round_up(min(batch_tile, _round_up(B, 8)), 8))
    if B >= 16:
        # Guarantee >= 2 grid steps so "parallel" spreads work over both v7x TCs.
        TB = min(TB, _round_up((B + 1) // 2, 8))
    budget = int(0.9 * vmem_limit)
    while TB > 8 and _tile_bytes(TB) > budget:
        TB -= 8
    # TODO(synk): for very long sequences, add a T ("arbitrary") grid axis with a
    # running-max VMEM accumulator instead of shrinking TB all the way to 8.

    Bp = _round_up(B, TB)
    if Bp > B:
        x = jnp.pad(x, ((0, Bp - B), (0, 0), (0, 0)))
    grid = (Bp // TB,)

    kernel = functools.partial(_textcnn_kernel, T_used)

    out = pl.pallas_call(
        kernel,
        out_shape=jax.ShapeDtypeStruct((Bp, Cpad), jnp.float32),
        grid_spec=pltpu.PrefetchScalarGridSpec(
            num_scalar_prefetch=0,
            grid=grid,
            in_specs=[
                pl.BlockSpec((TB, L_pad, Epad), lambda i: (i, 0, 0)),      # batch tile
                pl.BlockSpec((k_max, Epad, Fpad), lambda i: (0, 0, 0)),    # conv weights
                pl.BlockSpec((T_used, Fpad), lambda i: (0, 0)),            # pool bias/mask
                pl.BlockSpec((Fpad, Cpad), lambda i: (0, 0)),              # fc weight^T
                pl.BlockSpec((1, Cpad), lambda i: (0, 0)),                 # fc bias
            ],
            out_specs=pl.BlockSpec((TB, Cpad), lambda i: (i, 0)),
        ),
        compiler_params=pltpu.CompilerParams(
            dimension_semantics=("parallel",),
            vmem_limit_bytes=int(vmem_limit),
        ),
    )(x, w_conv, pool_bias, fc_wT, fc_bp)

    return out[:B, :C]


def _reference_forward(x_emb, conv_params, fc_w, fc_b, kernel_sizes):
    """Pure-JAX (f32) reference matching the PyTorch module in eval mode."""
    B, L, E = x_emb.shape
    pooled = []
    for (w, b), k in zip(conv_params, kernel_sizes):
        t_out = L - k + 1
        pool_k = L - 2 * k + 2
        acc = jnp.zeros((B, t_out, w.shape[0]), jnp.float32)
        for j in range(k):
            acc = acc + jnp.einsum('bte,fe->btf', x_emb[:, j:j + t_out, :], w[:, :, j])
        acc = jnp.maximum(acc + b[0][None, None, :], 0.0)
        pooled.append(jnp.max(acc[:, :pool_k, :], axis=1))
    feat = jnp.concatenate(pooled, axis=-1)
    return feat @ fc_w.T + fc_b[0][None, :]


if __name__ == "__main__":
    # Small shapes consistent with the module's forward.
    B, L, E, F, V, num_labels = 2, 8, 32, 16, 50, 5
    kernel_sizes = [2, 3]

    key = jax.random.PRNGKey(0)
    keys = jax.random.split(key, 8)

    emb_table = jax.random.normal(keys[0], (V, E), jnp.float32) * 0.1           # Embedding(V, E)
    token_ids = jax.random.randint(keys[1], (B, L), 0, V)                       # features['token_ids']
    conv_params = []
    for i, k in enumerate(kernel_sizes):
        w = jax.random.normal(keys[2 + i], (F, E, k), jnp.float32) * 0.1        # Conv1d weight (F, E, k)
        b = jax.random.normal(keys[4 + i], (1, F), jnp.float32) * 0.1           # Conv1d bias
        conv_params.append((w, b))
    fc_w = jax.random.normal(keys[6], (num_labels, F * len(kernel_sizes)), jnp.float32) * 0.1
    fc_b = jax.random.normal(keys[7], (1, num_labels), jnp.float32) * 0.1

    # Embedding lookup (gather) kept in JAX glue.
    # TODO(synk): fuse this gather into the kernel (scalar-prefetched token_ids driving a
    # manual-DMA row gather from the embedding table) to avoid materializing x_emb in HBM.
    x_emb = jnp.take(emb_table, token_ids, axis=0)   # (B, L, E)

    ref = _reference_forward(x_emb, conv_params, fc_w, fc_b, kernel_sizes)

    # Exact f32 path (matches PyTorch numerics).
    logits = textcnn_forward(x_emb, conv_params, fc_w, fc_b, kernel_sizes,
                             compute_dtype=jnp.float32)
    logits = jax.block_until_ready(logits)
    assert logits.shape == (B, num_labels)
    assert jnp.allclose(logits, ref, atol=1e-4, rtol=1e-4)

    # bf16 fast path (recommended on v5e/v6e/v7x: full-rate MXU, halved weight/activation
    # DMA; accumulation, biases and element-wise math stay f32).
    logits_bf16 = textcnn_forward(x_emb, conv_params, fc_w, fc_b, kernel_sizes,
                                  compute_dtype=jnp.bfloat16)
    logits_bf16 = jax.block_until_ready(logits_bf16)
    assert logits_bf16.shape == (B, num_labels)
    assert jnp.allclose(logits_bf16, ref, atol=3e-2, rtol=3e-2)

    print("KERNEL_OK")
</pallas_src>

<mosaic_0001>
module attributes {stable_mosaic.version = 11 : i64} {
  func.func @_textcnn_kernel(%arg0: i32, %arg1: memref<8x8x128xf32, #tpu.memory_space<vmem>>, %arg2: memref<3x128x128xf32, #tpu.memory_space<vmem>>, %arg3: memref<6x128xf32, #tpu.memory_space<vmem>>, %arg4: memref<128x128xf32, #tpu.memory_space<vmem>>, %arg5: memref<1x128xf32, #tpu.memory_space<vmem>>, %arg6: memref<8x128xf32, #tpu.memory_space<vmem>>) attributes {dimension_semantics = [#tpu.dimension_semantics<parallel>], iteration_bounds = array<i64: 1>, scalar_prefetch = 0 : i64, scratch_operands = 0 : i64, tpu.core_type = #tpu.core_type<tc>, window_params = [{transform_indices = @transform_0, window_bounds = array<i64: 8, 8, 128>}, {pipeline_mode = #tpu.pipeline_mode<synchronous>, transform_indices = @transform_1, window_bounds = array<i64: 3, 128, 128>}, {pipeline_mode = #tpu.pipeline_mode<synchronous>, transform_indices = @transform_2, window_bounds = array<i64: 6, 128>}, {pipeline_mode = #tpu.pipeline_mode<synchronous>, transform_indices = @transform_3, window_bounds = array<i64: 128, 128>}, {pipeline_mode = #tpu.pipeline_mode<synchronous>, transform_indices = @transform_4, window_bounds = array<i64: 1, 128>}, {transform_indices = @transform_5, window_bounds = array<i64: 8, 128>}]} {
    %c0 = arith.constant 0 : index
    %c0_0 = arith.constant 0 : index
    %c0_1 = arith.constant 0 : index
    %0 = vector.load %arg1[%c0, %c0_0, %c0_1] : memref<8x8x128xf32, #tpu.memory_space<vmem>>, vector<8x6x128xf32>
    %c0_2 = arith.constant 0 : index
    %c0_3 = arith.constant 0 : index
    %c0_4 = arith.constant 0 : index
    %1 = vector.load %arg2[%c0_2, %c0_3, %c0_4] : memref<3x128x128xf32, #tpu.memory_space<vmem>>, vector<1x128x128xf32>
    %2 = vector.shape_cast %1 : vector<1x128x128xf32> to vector<128x128xf32>
    %cst = arith.constant dense<0.000000e+00> : vector<8x6x128xf32>
    %3 = tpu.matmul %0, %2, %cst {dimension_numbers = #tpu.dot_dimension_numbers<[2], [0], [0, 1], [1], [0, 0, 0, 1, 1, 1], [], []>} : vector<8x6x128xf32>, vector<128x128xf32>, vector<8x6x128xf32> -> vector<8x6x128xf32>
    %c0_5 = arith.constant 0 : index
    %c1 = arith.constant 1 : index
    %c0_6 = arith.constant 0 : index
    %4 = vector.load %arg1[%c0_5, %c1, %c0_6] : memref<8x8x128xf32, #tpu.memory_space<vmem>>, vector<8x6x128xf32>
    %c1_7 = arith.constant 1 : index
    %c0_8 = arith.constant 0 : index
    %c0_9 = arith.constant 0 : index
    %5 = vector.load %arg2[%c1_7, %c0_8, %c0_9] : memref<3x128x128xf32, #tpu.memory_space<vmem>>, vector<1x128x128xf32>
    %6 = vector.shape_cast %5 : vector<1x128x128xf32> to vector<128x128xf32>
    %cst_10 = arith.constant dense<0.000000e+00> : vector<8x6x128xf32>
    %7 = tpu.matmul %4, %6, %cst_10 {dimension_numbers = #tpu.dot_dimension_numbers<[2], [0], [0, 1], [1], [0, 0, 0, 1, 1, 1], [], []>} : vector<8x6x128xf32>, vector<128x128xf32>, vector<8x6x128xf32> -> vector<8x6x128xf32>
    %8 = arith.addf %3, %7 : vector<8x6x128xf32>
    %c0_11 = arith.constant 0 : index
    %c2 = arith.constant 2 : index
    %c0_12 = arith.constant 0 : index
    %9 = vector.load %arg1[%c0_11, %c2, %c0_12] : memref<8x8x128xf32, #tpu.memory_space<vmem>>, vector<8x6x128xf32>
    %c2_13 = arith.constant 2 : index
    %c0_14 = arith.constant 0 : index
    %c0_15 = arith.constant 0 : index
    %10 = vector.load %arg2[%c2_13, %c0_14, %c0_15] : memref<3x128x128xf32, #tpu.memory_space<vmem>>, vector<1x128x128xf32>
    %11 = vector.shape_cast %10 : vector<1x128x128xf32> to vector<128x128xf32>
    %cst_16 = arith.constant dense<0.000000e+00> : vector<8x6x128xf32>
    %12 = tpu.matmul %9, %11, %cst_16 {dimension_numbers = #tpu.dot_dimension_numbers<[2], [0], [0, 1], [1], [0, 0, 0, 1, 1, 1], [], []>} : vector<8x6x128xf32>, vector<128x128xf32>, vector<8x6x128xf32> -> vector<8x6x128xf32>
    %13 = arith.addf %8, %12 : vector<8x6x128xf32>
    %c0_17 = arith.constant 0 : index
    %c0_18 = arith.constant 0 : index
    %14 = vector.load %arg3[%c0_17, %c0_18] : memref<6x128xf32, #tpu.memory_space<vmem>>, vector<6x128xf32>
    %15 = vector.shape_cast %14 : vector<6x128xf32> to vector<1x6x128xf32>
    %16 = vector.broadcast %15 : vector<1x6x128xf32> to vector<8x6x128xf32>
    %17 = arith.addf %13, %16 : vector<8x6x128xf32>
    %cst_19 = arith.constant 0.000000e+00 : f32
    %18 = vector.broadcast %cst_19 : f32 to vector<8x6x128xf32>
    %19 = arith.maximumf %17, %18 : vector<8x6x128xf32>
    %cst_20 = arith.constant dense<0xFF800000> : vector<8x128xf32>
    %20 = vector.multi_reduction <maximumf>, %19, %cst_20 [1] : vector<8x6x128xf32> to vector<8x128xf32>
    %c0_21 = arith.constant 0 : index
    %c0_22 = arith.constant 0 : index
    %21 = vector.load %arg4[%c0_21, %c0_22] : memref<128x128xf32, #tpu.memory_space<vmem>>, vector<128x128xf32>
    %cst_23 = arith.constant dense<0.000000e+00> : vector<8x128xf32>
    %22 = tpu.matmul %20, %21, %cst_23 {dimension_numbers = #tpu.dot_dimension_numbers<[1], [0], [0], [1], [0, 0, 1, 1], [], []>} : vector<8x128xf32>, vector<128x128xf32>, vector<8x128xf32> -> vector<8x128xf32>
    %c0_24 = arith.constant 0 : index
    %c0_25 = arith.constant 0 : index
    %23 = vector.load %arg5[%c0_24, %c0_25] : memref<1x128xf32, #tpu.memory_space<vmem>>, vector<1x128xf32>
    %24 = vector.broadcast %23 : vector<1x128xf32> to vector<8x128xf32>
    %25 = arith.addf %22, %24 : vector<8x128xf32>
    %c0_26 = arith.constant 0 : index
    %c0_27 = arith.constant 0 : index
    %26 = vector.load %arg6[%c0_26, %c0_27] : memref<8x128xf32, #tpu.memory_space<vmem>>, vector<8x128xf32>
    tpu.vector_store %arg6[%c0_26, %c0_27], %25 {strides = array<i32>} : memref<8x128xf32, #tpu.memory_space<vmem>>, vector<8x128xf32>,
    return
  }
  func.func @transform_0(%arg0: i32) -> (i32, i32, i32) {
    %c0_i32 = arith.constant 0 : i32
    %c0_i32_0 = arith.constant 0 : i32
    %c0_i32_1 = arith.constant 0 : i32
    return %arg0, %c0_i32, %c0_i32_0 : i32, i32, i32
  }
  func.func @transform_1(%arg0: i32) -> (i32, i32, i32) {
    %c0_i32 = arith.constant 0 : i32
    %c0_i32_0 = arith.constant 0 : i32
    %c0_i32_1 = arith.constant 0 : i32
    %c0_i32_2 = arith.constant 0 : i32
    return %c0_i32, %c0_i32_0, %c0_i32_1 : i32, i32, i32
  }
  func.func @transform_2(%arg0: i32) -> (i32, i32) {
    %c0_i32 = arith.constant 0 : i32
    %c0_i32_0 = arith.constant 0 : i32
    %c0_i32_1 = arith.constant 0 : i32
    return %c0_i32, %c0_i32_0 : i32, i32
  }
  func.func @transform_3(%arg0: i32) -> (i32, i32) {
    %c0_i32 = arith.constant 0 : i32
    %c0_i32_0 = arith.constant 0 : i32
    %c0_i32_1 = arith.constant 0 : i32
    return %c0_i32, %c0_i32_0 : i32, i32
  }
  func.func @transform_4(%arg0: i32) -> (i32, i32) {
    %c0_i32 = arith.constant 0 : i32
    %c0_i32_0 = arith.constant 0 : i32
    %c0_i32_1 = arith.constant 0 : i32
    return %c0_i32, %c0_i32_0 : i32, i32
  }
  func.func @transform_5(%arg0: i32) -> (i32, i32) {
    %c0_i32 = arith.constant 0 : i32
    %c0_i32_0 = arith.constant 0 : i32
    return %arg0, %c0_i32 : i32, i32
  }
}

</mosaic_0001>

<bundles_post_ra>
// kernel: tpu_custom_call.1
= control target key start
LH: loop header
LB: loop body
LE: loop exit
PB: predicated region body
PF: predicated region fallthrough
CT: control target
= control target key end

     0   :  { %10 = vsyncpa [#allocation3], 0  ;;  %s2825_s0 = inlined_call_operand.hbm [shape: f32[8,8,128], index: 0, kind: input, shape index: {}]   ;;  %s2826_s1 = inlined_call_operand.hbm [shape: f32[3,128,128], index: 1, kind: input, shape index: {}]   ;;  %s2827_s2 = inlined_call_operand.hbm [shape: f32[6,128], index: 2, kind: input, shape index: {}]   ;;  %s2828_s3 = inlined_call_operand.hbm [shape: f32[128,128], index: 3, kind: input, shape index: {}]   ;;  %s2829_s4 = inlined_call_operand.vmem [shape: f32[1,128], index: 4, kind: input, shape index: {}]   ;;  %s2830_s5 = inlined_call_operand.hbm [shape: f32[8,128], index: 5, kind: output, shape index: {}]  }
   0x1   :  { %11 = vsyncpa [#allocation6], 0 }
   0x2   :  { %12 = vsyncpa [#allocation9], 0 }
   0x3   :  { %13 = vsyncpa [#allocation4], 0  ;;  %s2395_s18 = smov [#allocation5]   ;;  %s2396_s20 = smov [#allocation2]  }
   0x4   :  { %s31_s19 = sshll.u32 %s2395_s18, 4  ;;  %s19_s21 = sshll.u32 %s2396_s20, 4  ;;  %s32_s19 = int_to_ptr.vmem [resolvable:$true] %s31_s19  ;;  %s2436_s21 = int_to_ptr.vmem [resolvable:$true] %s19_s21 }
   0x5   :  { %s2277_s24 = scalar_lea.hbm %s2826_s1, 6144 }
   0x6   :  { %p2278_p0 = scmp.ne.s32.totalorder %s2826_s1, %s2277_s24  ;;  %p2281_p1 = scmp.lt.u32.totalorder %s2277_s24, %s2826_s1 }
   0x8   :  { %p2283_p2 = pnand %p2281_p1, %p2278_p0 }
   0xa   :  { %2286 = shalt.err (!%p2283_p2)
}
   0xb   :  { %s2287_s29 = scalar_lea.vmem %s32_s19, 6144  ;;  %p2292_p4 = scmp.lt.s32.totalorder %s32_s19, %s32_s19 }
   0xc   :  { %p2288_p3 = scmp.ne.s32.totalorder %s32_s19, %s2287_s29  ;;  %p2293_p5 = scmp.lt.s32.totalorder %s2287_s29, %s2287_s29 }
   0xe   :  { %p2294_p6 = por %p2293_p5, %p2292_p4 }
  0x10   :  { %p2295_p7 = pnand %p2294_p6, %p2288_p3 }
  0x12   :  { %2298 = shalt.err (!%p2295_p7)
}
  0x13   :  { %s2397_s30 = smov 128   ;;  %s2398_s6 = smov 8  }
  0x14   :  { %37 = dma.hbm_to_vmem [thread:$0]  %s2826_s1, 6144, %s32_s19, [#allocation6], %s2397_s30, %s2397_s30, %s2398_s6  }
  0x15   :  { %s2299_s11 = scalar_lea.hbm %s2825_s0, 1024 }
  0x16   :  { %p2300_p8 = scmp.ne.s32.totalorder %s2825_s0, %s2299_s11  ;;  %p2303_p9 = scmp.lt.u32.totalorder %s2299_s11, %s2825_s0 }
  0x18   :  { %p2305_p10 = pnand %p2303_p9, %p2300_p8 }
  0x1a   :  { %2308 = shalt.err (!%p2305_p10)
}
  0x1b   :  { %s2309_s16 = scalar_lea.vmem %s2436_s21, 1024  ;;  %p2314_p12 = scmp.lt.s32.totalorder %s2436_s21, %s2436_s21 }
  0x1c   :  { %p2310_p11 = scmp.ne.s32.totalorder %s2436_s21, %s2309_s16  ;;  %p2315_p13 = scmp.lt.s32.totalorder %s2309_s16, %s2309_s16 }
  0x1e   :  { %p2316_p0 = por %p2315_p13, %p2314_p12 }
  0x20   :  { %p2317_p1 = pnand %p2316_p0, %p2310_p11 }
  0x22   :  { %2320 = shalt.err (!%p2317_p1)
}
  0x23   :  { %25 = dma.hbm_to_vmem [thread:$0]  %s2825_s0, 1024, %s2436_s21, [#allocation3], %s2397_s30, %s2397_s30, %s2398_s6  }
  0x24   :  { %s2399_s18 = smov [#allocation7]   ;;  %s2400_s20 = smov [#allocation8]  }
  0x25   :  { %s44_s19 = sshll.u32 %s2399_s18, 4  ;;  %s53_s22 = sshll.u32 %s2400_s20, 4  ;;  %s45_s19 = int_to_ptr.vmem [resolvable:$true] %s44_s19  ;;  %s2473_s22 = int_to_ptr.vmem [resolvable:$true] %s53_s22 }
  0x26   :  { %s2321_s25 = scalar_lea.hbm %s2827_s2, 128 }
  0x27   :  { %p2322_p2 = scmp.ne.s32.totalorder %s2827_s2, %s2321_s25  ;;  %p2325_p3 = scmp.lt.u32.totalorder %s2321_s25, %s2827_s2 }
  0x29   :  { %p2327_p4 = pnand %p2325_p3, %p2322_p2 }
  0x2b   :  { %2330 = shalt.err (!%p2327_p4)
}
  0x2c   :  { %s2331_s0 = scalar_lea.vmem %s45_s19, 128  ;;  %p2336_p6 = scmp.lt.s32.totalorder %s45_s19, %s45_s19 }
  0x2d   :  { %p2332_p5 = scmp.ne.s32.totalorder %s45_s19, %s2331_s0  ;;  %p2337_p7 = scmp.lt.s32.totalorder %s2331_s0, %s2331_s0 }
  0x2f   :  { %p2338_p8 = por %p2337_p7, %p2336_p6 }
  0x31   :  { %p2339_p9 = pnand %p2338_p8, %p2332_p5 }
  0x33   :  { %2342 = shalt.err (!%p2339_p9)
}
  0x34   :  { %47 = dma.hbm_to_vmem [thread:$0]  %s2827_s2, 128, %s45_s19, [#allocation6]  }
  0x35   :  { %s2343_s10 = scalar_lea.hbm %s2828_s3, 2048 }
  0x36   :  { %p2344_p10 = scmp.ne.s32.totalorder %s2828_s3, %s2343_s10  ;;  %p2347_p11 = scmp.lt.u32.totalorder %s2343_s10, %s2828_s3 }
  0x38   :  { %p2349_p12 = pnand %p2347_p11, %p2344_p10 }
  0x3a   :  { %2352 = shalt.err (!%p2349_p12)
}
  0x3b   :  { %s2353_s15 = scalar_lea.vmem %s2473_s22, 2048  ;;  %p2358_p0 = scmp.lt.s32.totalorder %s2473_s22, %s2473_s22 }
  0x3c   :  { %p2354_p13 = scmp.ne.s32.totalorder %s2473_s22, %s2353_s15  ;;  %p2359_p1 = scmp.lt.s32.totalorder %s2353_s15, %s2353_s15 }
  0x3e   :  { %p2360_p2 = por %p2359_p1, %p2358_p0 }
  0x40   :  { %p2361_p3 = pnand %p2360_p2, %p2354_p13 }
  0x42   :  { %2364 = shalt.err (!%p2361_p3)
}
  0x43   :  { %59 = dma.hbm_to_vmem [thread:$0]  %s2828_s3, 2048, %s2473_s22, [#allocation9], %s2397_s30, %s2397_s30, %s2398_s6  }
  0x44   :  { %2387 = dma.done.wait [#allocation3], 1024  }
  0x45   :  { %2388 = vsyncadd [#allocation3], 4294966272 }
  0x46   :  { %2389 = dma.done.wait [#allocation6], 6272  }
  0x47   :  { %2390 = vsyncadd [#allocation6], 4294961024 }
  0x48   :  { %2391 = dma.done.wait [#allocation9], 2048  }
  0x49   :  { %2392 = vsyncadd [#allocation9], 4294965248  ;;  %v2401_v0 = vmov 1983009808   ;;  %v135_v2 = vlaneseq  ;;  %v107_v5 = vld [vmem:[#allocation5 + $0x80] sm:$0xff]  ;;  %v108_v6 = vld [vmem:[#allocation5 + $0x88] sm:$0xff] }
  0x4a   :  { %v133_v1 = vunpack.c.l.s4 %v2401_v0  ;;  %v109_v7 = vld [vmem:[#allocation5 + $0x90] sm:$0xff]  ;;  %v2115_v8 = vpack.c.bf16 %v108_v6, %v107_v5  ;;  %v110_v9 = vld [vmem:[#allocation5 + $0x98] sm:$0xff]  ;;  %v111_v11 = vld [vmem:[#allocation5 + $0xa0] sm:$0xff]  ;;  %vm2403_vm0 = vmmov 0   ;;  %vm1682_vm1 = vcmask 1045504   ;;  %s2405_s6 = smov [#allocation10]  }
  0x4b   :  { %v136_v4 = vshrl.u32 %v135_v2, 7  ;;  %v2119_v10 = vpack.c.bf16 %v110_v9, %v109_v7  ;;  %v112_v12 = vld [vmem:[#allocation5 + $0xa8] sm:$0xff]  ;;  %v113_v15 = vld [vmem:[#allocation5 + $0xb0] sm:$0xff]  ;;  %v942_v16 = vld [vmem:[#allocation5 + $0x100] sm:$0xff]  ;;  %vm1770_vm2 = vcmask 1041409   ;;  %vm1772_vm3 = vcmask 1042434  }
  0x4c   :  { %v134_v3 = vunpack.c.0.s8 %v133_v1  ;;  %2116 = vmatprep.subr.bf16.mxu0 %v2115_v8  ;;  %v2123_v14 = vpack.c.bf16 %v112_v12, %v111_v11  ;;  %v943_v17 = vld [vmem:[#allocation5 + $0x108] sm:$0xff]  ;;  %v114_v18 = vld [vmem:[#allocation5 + $0xb8] sm:$0xff]  ;;  %v98_v20 = vld [vmem:[#allocation2 + $0x1] sm:$0x3f]  ;;  %vm1774_vm4 = vcmask 1043459   ;;  %vm1776_vm5 = vcmask 1044484  }
  0x4d   :  { %2118 = vmatpush3.bf16.msra.mxu0 %v2115_v8  ;;  %v2179_v19 = vpack.c.bf16 %v943_v17, %v942_v16  ;;  %v99_v21 = vld [vmem:[#allocation2 + $0x9] sm:$0x3f]  ;;  %v131_v22 = vcombine.high %v98_v20, %v98_v20  ;;  %v100_v26 = vld [vmem:[#allocation2 + $0x11] sm:$0x3f]  ;;  %v945_v29 = vld [vmem:[#allocation5 + $0x118] sm:$0xff]  ;;  %v2127_v30 = vpack.c.bf16 %v114_v18, %v113_v15  ;;  %vm1778_vm6 = vcmask 1045509  }
  0x4e   :  { %v2507_v13 = vsub.s32 %v134_v3, %v136_v4  ;;  %2120 = vmatprep.subr.bf16.mxu0 %v2119_v10  ;;  %v147_v24 = vcombine.high %v99_v21, %v99_v21  ;;  %v944_v27 = vld [vmem:[#allocation5 + $0x110] sm:$0xff]  ;;  %v946_v33 = vld [vmem:[#allocation5 + $0x120] sm:$0xff]  ;;  %v947_v34 = vld [vmem:[#allocation5 + $0x128] sm:$0xff]  ;;  %v163_v48 = vcombine.high %v100_v26, %v100_v26  ;;  %vm1780_vm7 = vcmask 1046534   ;;  %s1862_s1 = sshll.u32 %s2405_s6, 4  ;;  %s1863_s1 = int_to_ptr.vmem [resolvable:$true] %s1862_s1 }
  0x4f   :  { %2180 = vmatprep.subr.bf16.mxu1 %v2179_v19  ;;  %v115_v35 = vld [vmem:[#allocation5 + $0xc0] sm:$0xff]  ;;  %v116_v36 = vld [vmem:[#allocation5 + $0xc8] sm:$0xff]  ;;  %v2183_v39 = vpack.c.bf16 %v945_v29, %v944_v27  ;;  %v117_v40 = vld [vmem:[#allocation5 + $0xd0] sm:$0xff]  ;;  %v2187_v44 = vpack.c.bf16 %v947_v34, %v946_v33  ;;  %vm1782_vm8 = vcmask 1047559   ;;  %s2365_s17 = scalar_lea.vmem %s1863_s1, 128  ;;  %p2370_p5 = scmp.lt.s32.totalorder %s1863_s1, %s1863_s1 }
  0x50   :  { %v138_v23 = vrot.slane %v98_v20, %v2507_v13  ;;  %v154_v25 = vrot.slane %v99_v21, %v2507_v13  ;;  %v170_v28 = vrot.slane %v100_v26, %v2507_v13  ;;  %v145_v31 = vrot.slane %v131_v22, %v2507_v13  ;;  %2182 = vmatpush3.bf16.msra.mxu1 %v2179_v19  ;;  %v118_v45 = vld [vmem:[#allocation5 + $0xd8] sm:$0xff]  ;;  %v948_v46 = vld [vmem:[#allocation5 + $0x130] sm:$0xff]  ;;  %v119_v50 = vld [vmem:[#allocation5 + $0xe0] sm:$0xff]  ;;  %p2366_p4 = scmp.ne.s32.totalorder %s1863_s1, %s2365_s17  ;;  %p2371_p6 = scmp.lt.s32.totalorder %s2365_s17, %s2365_s17 }
  0x51   :  { %2122 = vmatpush3.bf16.msra.mxu0 %v2119_v10  ;;  %v161_v38 = vrot.slane %v147_v24, %v2507_v13  ;;  %2184 = vmatprep.subr.bf16.mxu1 %v2183_v39  ;;  %v949_v47 = vld [vmem:[#allocation5 + $0x138] sm:$0xff]  ;;  %v2131_v49 = vpack.c.bf16 %v116_v36, %v115_v35  ;;  %v120_v51 = vld [vmem:[#allocation5 + $0xe8] sm:$0xff]  ;;  %v121_v54 = vld [vmem:[#allocation5 + $0xf0] sm:$0xff]  ;;  %v2516_v57 = vpack.c.bf16 %v118_v45, %v117_v40 }
  0x52   :  { %2124 = vmatprep.subr.bf16.mxu0 %v2123_v14  ;;  %v146_v32 = vcombine.high %v138_v23, %v138_v23  ;;  %v162_v37 = vcombine.high %v154_v25, %v154_v25  ;;  %v260_v42 = vcombine.low %v145_v31, %v154_v25  ;;  %v178_v43 = vcombine.high %v170_v28, %v170_v28  ;;  %v101_v56 = vld [vmem:[#allocation2 + $0x19] sm:$0x3f]  ;;  %v102_v62 = vld [vmem:[#allocation2 + $0x21] sm:$0x3f]  ;;  %v103_v63 = vld [vmem:[#allocation2 + $0x29] sm:$0x3f]  ;;  %p2372_p7 = por %p2371_p6, %p2370_p5 }
  0x53   :  { %v122_v58 = vld [vmem:[#allocation5 + $0xf8] sm:$0xff]  ;;  %v2191_v61 = vpack.c.bf16 %v949_v47, %v948_v46  ;;  %v2518_v0 = vpack.c.bf16 %v120_v51, %v119_v50  ;;  %v950_v1 = vld [vmem:[#allocation5 + $0x140] sm:$0xff]  ;;  %v951_v2 = vld [vmem:[#allocation5 + $0x148] sm:$0xff]  ;;  %v177_v3 = vrot.slane %v163_v48, %v2507_v13  ;;  %v179_v4 = vcombine.high %v101_v56, %v101_v56 }
  0x54   :  { %v259_v41 = vcombine.low %v138_v23, %v146_v32  ;;  %v274_v53 = vrot.slane %v260_v42, %v2507_v13  ;;  %2186 = vmatpush3.bf16.msra.mxu1 %v2183_v39  ;;  %v276_v55 = vcombine.low %v162_v37, %v161_v38  ;;  %v277_v60 = vcombine.low %v170_v28, %v178_v43  ;;  %v104_v9 = vld [vmem:[#allocation2 + $0x31] sm:$0x3f]  ;;  %v82_v11 = vld [vmem:[#allocation5] sm:$0xff]  ;;  %v83_v12 = vld [vmem:[#allocation5 + $0x8] sm:$0xff]  ;;  %p2373_p8 = pnand %p2372_p7, %p2366_p4 }
  0x55   :  { %2126 = vmatpush3.bf16.msra.mxu0 %v2123_v14  ;;  %2188 = vmatprep.subr.bf16.mxu1 %v2187_v44  ;;  %v186_v5 = vrot.slane %v101_v56, %v2507_v13  ;;  %v195_v6 = vcombine.high %v102_v62, %v102_v62  ;;  %v202_v7 = vrot.slane %v102_v62, %v2507_v13  ;;  %v84_v15 = vld [vmem:[#allocation5 + $0x10] sm:$0xff]  ;;  %v85_v19 = vld [vmem:[#allocation5 + $0x18] sm:$0xff]  ;;  %v86_v20 = vld [vmem:[#allocation5 + $0x20] sm:$0xff] }
  0x56   :  { %2128 = vmatprep.subr.bf16.mxu0 %v2127_v30  ;;  %v267_v52 = vrot.slane %v259_v41, %v2507_v13  ;;  %v2524_v8 = vrot.slane %v103_v63, %v2507_v13  ;;  %v2526_v10 = vpack.c.bf16 %v122_v58, %v121_v54  ;;  %v284_v14 = vrot.slane %v276_v55, %v2507_v13  ;;  %v105_v24 = vld [vmem:[#allocation2 + $0x39] sm:$0x3f]  ;;  %v87_v25 = vld [vmem:[#allocation5 + $0x28] sm:$0xff]  ;;  %v952_v26 = vld [vmem:[#allocation5 + $0x150] sm:$0xff] }
  0x57   :  { %v193_v16 = vrot.slane %v179_v4, %v2507_v13  ;;  %v194_v17 = vcombine.high %v186_v5, %v186_v5  ;;  %v291_v18 = vrot.slane %v277_v60, %v2507_v13  ;;  %v2195_v21 = vpack.c.bf16 %v951_v2, %v950_v1  ;;  %v953_v27 = vld [vmem:[#allocation5 + $0x158] sm:$0xff]  ;;  %v954_v33 = vld [vmem:[#allocation5 + $0x160] sm:$0xff]  ;;  %v955_v34 = vld [vmem:[#allocation5 + $0x168] sm:$0xff] }
  0x58   :  { %v275_v59 = vcombine.low %v267_v52, %v274_v53  ;;  %2190 = vmatpush3.bf16.msra.mxu1 %v2187_v44  ;;  %v210_v22 = vcombine.high %v202_v7, %v202_v7  ;;  %v211_v23 = vcombine.high %v103_v63, %v103_v63  ;;  %v293_v28 = vcombine.low %v177_v3, %v186_v5  ;;  %v956_v41 = vld [vmem:[#allocation5 + $0x170] sm:$0xff]  ;;  %v957_v42 = vld [vmem:[#allocation5 + $0x178] sm:$0xff]  ;;  %v933_v48 = vld [vmem:[#allocation2 + $0x2] sm:$0x3f] }
  0x59   :  { %2130 = vmatpush3.bf16.msra.mxu0 %v2127_v30  ;;  %2192 = vmatprep.subr.bf16.mxu1 %v2191_v61  ;;  %v209_v29 = vrot.slane %v195_v6, %v2507_v13  ;;  %v226_v30 = vcombine.high %v2524_v8, %v2524_v8  ;;  %v234_v31 = vrot.slane %v104_v9, %v2507_v13  ;;  %v934_v53 = vld [vmem:[#allocation2 + $0xa] sm:$0x3f]  ;;  %v74_v54 = vld [vmem:[#allocation2] sm:$0x3f] }
  0x5a   :  { %2132 = vmatprep.subr.bf16.mxu0 %v2131_v49  ;;  %1989 = vmatprep.mubr.f32.mxu0 %v275_v59  ;;  %v2536_v32 = vcombine.low %v194_v17, %v193_v16  ;;  %v2538_v35 = vcombine.low %v202_v7, %v210_v22  ;;  %v225_v36 = vrot.slane %v211_v23, %v2507_v13  ;;  %v2564_v3 = vld [vmem:[#allocation2 + $0x8] sm:$0x3f] }
  0x5b   :  { %v227_v37 = vcombine.high %v104_v9, %v104_v9  ;;  %v2541_v38 = vpack.c.bf16 %v83_v12, %v82_v11  ;;  %v2543_v39 = vpack.c.bf16 %v85_v19, %v84_v15  ;;  %v242_v40 = vcombine.high %v234_v31, %v234_v31  ;;  %v935_v9 = vld [vmem:[#allocation2 + $0x12] sm:$0x3f] }
  0x5c   :  { %2194 = vmatpush3.bf16.msra.mxu1 %v2191_v61  ;;  %v243_v43 = vcombine.high %v105_v24, %v105_v24  ;;  %v2545_v44 = vcombine.low %v284_v14, %v291_v18  ;;  %v2547_v45 = vpack.c.bf16 %v87_v25, %v86_v20  ;;  %v2199_v46 = vpack.c.bf16 %v953_v27, %v952_v26 }
  0x5d   :  { %2134 = vmatpush3.bf16.msra.mxu0 %v2131_v49  ;;  %2196 = vmatprep.subr.bf16.mxu1 %v2195_v21  ;;  %v250_v47 = vrot.slane %v105_v24, %v2507_v13  ;;  %v301_v49 = vrot.slane %v293_v28, %v2507_v13  ;;  %v2203_v50 = vpack.c.bf16 %v955_v34, %v954_v33  ;;  %v936_v34 = vld [vmem:[#allocation2 + $0x1a] sm:$0x3f] }
  0x5e   :  { %2136 = vmatprep.subr.bf16.mxu0 %v2516_v57  ;;  %v311_v51 = vcombine.low %v209_v29, %v2524_v8  ;;  %v327_v52 = vcombine.low %v226_v30, %v225_v36  ;;  %v308_v55 = vrot.slane %v2536_v32, %v2507_v13  ;;  %v318_v56 = vrot.slane %v2538_v35, %v2507_v13 }
  0x5f   :  { %v2558_v58 = vpack.c.bf16 %v957_v42, %v956_v41  ;;  %v328_v59 = vcombine.low %v234_v31, %v242_v40  ;;  %v257_v60 = vrot.slane %v243_v43, %v2507_v13  ;;  %v966_v61 = vcombine.high %v933_v48, %v933_v48  ;;  %v937_v43 = vld [vmem:[#allocation2 + $0x22] sm:$0x3f] }
  0x60   :  { %2198 = vmatpush3.bf16.msra.mxu1 %v2195_v21  ;;  %v973_v62 = vrot.slane %v933_v48, %v2507_v13  ;;  %v258_v63 = vcombine.high %v250_v47, %v250_v47  ;;  %v982_v1 = vcombine.high %v934_v53, %v934_v53  ;;  %v989_v2 = vrot.slane %v934_v53, %v2507_v13  ;;  %v88_v48 = vld [vmem:[#allocation5 + $0x30] sm:$0xff] }
  0x61   :  { %2138 = vmatpush3.bf16.msra.mxu0 %v2516_v57  ;;  %v241_v57 = vrot.slane %v227_v37, %v2507_v13  ;;  %2200 = vmatprep.subr.bf16.mxu1 %v2199_v46  ;;  %v470_v4 = vcombine.high %v74_v54, %v74_v54  ;;  %v325_v5 = vrot.slane %v311_v51, %v2507_v13 }
  0x62   :  { %2140 = vmatprep.subr.bf16.mxu0 %v2518_v0  ;;  %v335_v6 = vrot.slane %v327_v52, %v2507_v13  ;;  %v980_v7 = vrot.slane %v966_v61, %v2507_v13  ;;  %v981_v8 = vcombine.high %v973_v62, %v973_v62  ;;  %v997_v12 = vcombine.high %v989_v2, %v989_v2  ;;  %v90_v61 = vld [vmem:[#allocation5 + $0x40] sm:$0xff] }
  0x63   :  { %v344_v11 = vcombine.low %v241_v57, %v250_v47  ;;  %v477_v14 = vrot.slane %v74_v54, %v2507_v13  ;;  %v484_v15 = vrot.slane %v470_v4, %v2507_v13  ;;  %v342_v16 = vrot.slane %v328_v59, %v2507_v13  ;;  %v77_v59 = vld [vmem:[#allocation2 + $0x18] sm:$0x3f]  ;;  %v94_v4 = vld [vmem:[#allocation5 + $0x60] sm:$0xff] }
  0x64   :  { %2202 = vmatpush3.bf16.msra.mxu1 %v2199_v46  ;;  %v1095_v17 = vcombine.low %v980_v7, %v989_v2  ;;  %v2576_v18 = vrot.slane %v2564_v3, %v2507_v13  ;;  %v345_v19 = vcombine.low %v258_v63, %v257_v60  ;;  %v996_v21 = vrot.slane %v982_v1, %v2507_v13  ;;  %v938_v60 = vld [vmem:[#allocation2 + $0x2a] sm:$0x3f]  ;;  %v92_v63 = vld [vmem:[#allocation5 + $0x50] sm:$0xff] }
  0x65   :  { %2142 = vmatpush3.bf16.msra.mxu0 %v2518_v0  ;;  %v1094_v0 = vcombine.low %v973_v62, %v981_v8  ;;  %2204 = vmatprep.subr.bf16.mxu1 %v2203_v50  ;;  %v485_v20 = vcombine.high %v477_v14, %v477_v14  ;;  %v1005_v22 = vrot.slane %v935_v9, %v2507_v13  ;;  %v91_v62 = vld [vmem:[#allocation5 + $0x48] sm:$0xff] }
  0x66   :  { %2144 = vmatprep.subr.bf16.mxu0 %v2526_v10  ;;  %v309_v23 = vcombine.low %v301_v49, %v308_v55  ;;  %v1109_v25 = vrot.slane %v1095_v17, %v2507_v13  ;;  %v599_v26 = vcombine.low %v484_v15, %v2576_v18  ;;  %v326_v27 = vcombine.low %v318_v56, %v325_v5  ;;  %v89_v49 = vld [vmem:[#allocation5 + $0x38] sm:$0xff] }
  0x67   :  { %v1102_v24 = vrot.slane %v1094_v0, %v2507_v13  ;;  %v598_v28 = vcombine.low %v477_v14, %v485_v20  ;;  %v1013_v29 = vcombine.high %v1005_v22, %v1005_v22  ;;  %v1111_v30 = vcombine.low %v997_v12, %v996_v21 }
  0x68   :  { %2206 = vmatpush3.bf16.msra.mxu1 %v2203_v50  ;;  %v343_v31 = vcombine.low %v335_v6, %v342_v16  ;;  %v352_v32 = vrot.slane %v344_v11, %v2507_v13  ;;  %v359_v35 = vrot.slane %v345_v19, %v2507_v13  ;;  %v613_v41 = vrot.slane %v599_v26, %v2507_v13  ;;  %v78_v26 = vld [vmem:[#allocation2 + $0x20] sm:$0x3f] }
  0x69   :  { %2146 = vmatpush3.bf16.msra.mxu0 %v2526_v10  ;;  %v1110_v33 = vcombine.low %v1102_v24, %v1109_v25  ;;  %v998_v10 = vcombine.high %v935_v9, %v935_v9  ;;  %2208 = vmatprep.subr.bf16.mxu1 %v2558_v58  ;;  %v1112_v36 = vcombine.low %v1005_v22, %v1013_v29  ;;  %v79_v29 = vld [vmem:[#allocation2 + $0x28] sm:$0x3f] }
  0x6a   :  { %2148 = vmatprep.subr.bf16.mxu0 %v2541_v38  ;;  %v1119_v37 = vrot.slane %v1111_v30, %v2507_v13  ;;  %v606_v40 = vrot.slane %v598_v28, %v2507_v13  ;;  %v1014_v47 = vcombine.high %v936_v34, %v936_v34  ;;  %v1021_v50 = vrot.slane %v936_v34, %v2507_v13 }
  0x6b   :  { %v1012_v42 = vrot.slane %v998_v10, %v2507_v13  ;;  %2071 = vmatprep.mubr.f32.mxu1 %v1110_v33  ;;  %v1126_v46 = vrot.slane %v1112_v36, %v2507_v13  ;;  %v360_v51 = vcombine.low %v352_v32, %v359_v35  ;;  %v1030_v54 = vcombine.high %v937_v43, %v937_v43 }
  0x6c   :  { %1990 = vmatmul.mubr.f32.vlgmr.msra.gmra.mrb[0].mxu0 %v2545_v44  ;;  %v486_v44 = vcombine.high %v2564_v3, %v2564_v3  ;;  %2210 = vmatpush3.bf16.msra.mxu1 %v2558_v58  ;;  %v1028_v53 = vrot.slane %v1014_v47, %v2507_v13  ;;  %v614_v55 = vcombine.low %v606_v40, %v613_v41  ;;  %v93_v3 = vld [vmem:[#allocation5 + $0x58] sm:$0xff] }
  0x6d   :  { %2150 = vmatpush3.bf16.msra.mxu0 %v2541_v38  ;;  %1992 = vmatprep.mubr.f32.mxu0 %v309_v23  ;;  %v76_v38 = vld [vmem:[#allocation2 + $0x10] sm:$0x3f]  ;;  %v1127_v52 = vcombine.low %v1119_v37, %v1126_v46  ;;  %v1029_v56 = vcombine.high %v1021_v50, %v1021_v50  ;;  %v1128_v57 = vcombine.low %v1012_v42, %v1021_v50  ;;  %v940_v40 = vld [vmem:[#allocation2 + $0x3a] sm:$0x3f] }
  0x6e   :  { %2152 = vmatprep.subr.bf16.mxu0 %v2543_v39  ;;  %v2159_v58 = vpack.c.bf16 %v89_v49, %v88_v48  ;;  %v500_v1 = vrot.slane %v486_v44, %v2507_v13  ;;  %v509_v2 = vrot.slane %v76_v38, %v2507_v13  ;;  %v502_v7 = vcombine.high %v76_v38, %v76_v38  ;;  %v80_v37 = vld [vmem:[#allocation2 + $0x30] sm:$0x3f] }
  0x6f   :  { %2072 = vmatmul.mubr.f32.vlgmr.msra.gmra.mrb[0].mxu1 %v1127_v52  ;;  %v1129_v5 = vcombine.low %v1029_v56, %v1028_v53  ;;  %v1136_v6 = vrot.slane %v1128_v57, %v2507_v13  ;;  %v1037_v8 = vrot.slane %v937_v43, %v2507_v13  ;;  %v518_v9 = vcombine.high %v77_v59, %v77_v59  ;;  %v81_v52 = vld [vmem:[#allocation2 + $0x38] sm:$0x3f]  ;;  %v96_v57 = vld [vmem:[#allocation5 + $0x70] sm:$0xff] }
  0x70   :  { %1993 = vmatmul.mubr.f32.gmra.mrb[2].mxu0 %v326_v27  ;;  %v2608_v11 = vrot.slane %v77_v59, %v2507_v13  ;;  %v1044_v12 = vrot.slane %v1030_v54, %v2507_v13  ;;  %v1053_v14 = vrot.slane %v938_v60, %v2507_v13  ;;  %v501_v15 = vcombine.high %v2576_v18, %v2576_v18  ;;  %v97_v59 = vld [vmem:[#allocation5 + $0x78] sm:$0xff] }
  0x71   :  { %2154 = vmatpush3.bf16.msra.mxu0 %v2543_v39  ;;  %1995 = vmatprep.mubr.f32.mxu0 %v343_v31  ;;  %v95_v39 = vld [vmem:[#allocation5 + $0x68] sm:$0xff]  ;;  %v1143_v16 = vrot.slane %v1129_v5, %v2507_v13  ;;  %v1045_v0 = vcombine.high %v1037_v8, %v1037_v8  ;;  %v2163_v17 = vpack.c.bf16 %v91_v62, %v90_v61 }
  0x72   :  { %2156 = vmatprep.subr.bf16.mxu0 %v2547_v45  ;;  %v2167_v19 = vpack.c.bf16 %v93_v3, %v92_v63  ;;  %v2616_v20 = vpack.c.bf16 %v95_v39, %v94_v4  ;;  %v1146_v21 = vcombine.low %v1044_v12, %v1053_v14  ;;  %v517_v22 = vcombine.high %v509_v2, %v509_v2 }
  0x73   :  { %v1144_v23 = vcombine.low %v1136_v6, %v1143_v16  ;;  %v516_v24 = vrot.slane %v502_v7, %v2507_v13  ;;  %v1145_v25 = vcombine.low %v1037_v8, %v1045_v0  ;;  %v532_v27 = vrot.slane %v518_v9, %v2507_v13 }
  0x74   :  { %1996 = vmatmul.mubr.f32.gmra.mrb[4].mxu0 %v360_v51  ;;  %v533_v18 = vcombine.high %v2608_v11, %v2608_v11  ;;  %v1160_v28 = vrot.slane %v1146_v21, %v2507_v13  ;;  %v1046_v30 = vcombine.high %v938_v60, %v938_v60  ;;  %v2623_v31 = vcombine.low %v501_v15, %v500_v1 }
  0x75   :  { %2158 = vmatpush3.bf16.msra.mxu0 %v2547_v45  ;;  %2030 = vmatprep.mubr.f32.mxu0 %v614_v55  ;;  %v939_v45 = vld [vmem:[#allocation2 + $0x32] sm:$0x3f]  ;;  %v1153_v32 = vrot.slane %v1145_v25, %v2507_v13  ;;  %v1061_v33 = vcombine.high %v1053_v14, %v1053_v14  ;;  %v534_v34 = vcombine.high %v78_v26, %v78_v26 }
  0x76   :  { %2160 = vmatprep.subr.bf16.mxu0 %v2159_v58  ;;  %2074 = vmatprep.mubr.f32.mxu1 %v1144_v23  ;;  %v541_v10 = vrot.slane %v78_v26, %v2507_v13  ;;  %v1060_v35 = vrot.slane %v1046_v30, %v2507_v13  ;;  %v1069_v36 = vrot.slane %v939_v45, %v2507_v13 }
  0x77   :  { %v616_v41 = vcombine.low %v509_v2, %v517_v22  ;;  %v632_v42 = vcombine.low %v516_v24, %v2608_v11  ;;  %v1161_v43 = vcombine.low %v1153_v32, %v1160_v28  ;;  %v557_v44 = vrot.slane %v79_v29, %v2507_v13 }
  0x78   :  { %v633_v46 = vcombine.low %v533_v18, %v532_v27  ;;  %v1077_v47 = vcombine.high %v1069_v36, %v1069_v36  ;;  %v1162_v48 = vcombine.low %v1061_v33, %v1060_v35  ;;  %v550_v49 = vcombine.high %v79_v29, %v79_v29 }
  0x79   :  { %2162 = vmatpush3.bf16.msra.mxu0 %v2159_v58  ;;  %2075 = vmatmul.mubr.f32.gmra.mrb[2].mxu1 %v1161_v43  ;;  %v573_v38 = vrot.slane %v80_v37, %v2507_v13  ;;  %v1062_v50 = vcombine.high %v939_v45, %v939_v45  ;;  %v1078_v51 = vcombine.high %v940_v40, %v940_v40  ;;  %v1742_v43 = vld [vmem:[#allocation8 + $0x18] sm:$0xff] }
  0x7a   :  { %2164 = vmatprep.subr.bf16.mxu0 %v2163_v17  ;;  %v548_v53 = vrot.slane %v534_v34, %v2507_v13  ;;  %v549_v54 = vcombine.high %v541_v10, %v541_v10  ;;  %v1163_v55 = vcombine.low %v1069_v36, %v1077_v47  ;;  %v1170_v56 = vrot.slane %v1162_v48, %v2507_v13  ;;  %v1739_v36 = vld [vmem:[#allocation8] sm:$0xff]  ;;  %v1744_v47 = vld [vmem:[#allocation8 + $0x28] sm:$0xff] }
  0x7b   :  { %v565_v60 = vcombine.high %v557_v44, %v557_v44  ;;  %v1076_v58 = vrot.slane %v1062_v50, %v2507_v13  ;;  %v1085_v61 = vrot.slane %v940_v40, %v2507_v13  ;;  %v1092_v62 = vrot.slane %v1078_v51, %v2507_v13  ;;  %v1747_v51 = vld [vmem:[#allocation8 + $0x40] sm:$0xff] }
  0x7c   :  { %v1177_v63 = vrot.slane %v1163_v55, %v2507_v13  ;;  %v564_v1 = vrot.slane %v550_v49, %v2507_v13  ;;  %v566_v2 = vcombine.high %v80_v37, %v80_v37  ;;  %v582_v3 = vcombine.high %v81_v52, %v81_v52  ;;  %v1740_v37 = vld [vmem:[#allocation8 + $0x8] sm:$0xff]  ;;  %v1745_v49 = vld [vmem:[#allocation8 + $0x30] sm:$0xff]  ;;  %v1750_v55 = vld [vmem:[#allocation8 + $0x58] sm:$0xff] }
  0x7d   :  { %2166 = vmatpush3.bf16.msra.mxu0 %v2163_v17  ;;  %v581_v4 = vcombine.high %v573_v38, %v573_v38  ;;  %v1093_v39 = vcombine.high %v1085_v61, %v1085_v61  ;;  %v1179_v5 = vcombine.low %v1076_v58, %v1085_v61  ;;  %v589_v6 = vrot.slane %v81_v52, %v2507_v13  ;;  %v1748_v52 = vld [vmem:[#allocation8 + $0x48] sm:$0xff]  ;;  %v1753_v61 = vld [vmem:[#allocation8 + $0x70] sm:$0xff] }
  0x7e   :  { %2168 = vmatprep.subr.bf16.mxu0 %v2167_v19  ;;  %v2175_v7 = vpack.c.bf16 %v97_v59, %v96_v57  ;;  %v623_v8 = vrot.slane %v2623_v31, %v2507_v13  ;;  %v630_v9 = vrot.slane %v616_v41, %v2507_v13  ;;  %v1178_v11 = vcombine.low %v1170_v56, %v1177_v63  ;;  %v1751_v57 = vld [vmem:[#allocation8 + $0x60] sm:$0xff]  ;;  %v1752_v59 = vld [vmem:[#allocation8 + $0x68] sm:$0xff] }
  0x7f   :  { %v640_v12 = vrot.slane %v632_v42, %v2507_v13  ;;  %v650_v14 = vcombine.low %v548_v53, %v557_v44  ;;  %v1180_v15 = vcombine.low %v1093_v39, %v1092_v62  ;;  %v1187_v16 = vrot.slane %v1179_v5, %v2507_v13  ;;  %v1741_v42 = vld [vmem:[#allocation8 + $0x10] sm:$0xff]  ;;  %v1754_v62 = vld [vmem:[#allocation8 + $0x78] sm:$0xff] }
  0x80   :  { %v649_v0 = vcombine.low %v541_v10, %v549_v54  ;;  %2077 = vmatprep.mubr.f32.mxu1 %v1178_v11  ;;  %v580_v17 = vrot.slane %v566_v2, %v2507_v13  ;;  %v597_v21 = vcombine.high %v589_v6, %v589_v6  ;;  %v647_v22 = vrot.slane %v633_v46, %v2507_v13  ;;  %v1743_v46 = vld [vmem:[#allocation8 + $0x20] sm:$0xff]  ;;  %v1749_v54 = vld [vmem:[#allocation8 + $0x50] sm:$0xff]  ;;  %v1453_v5 = vld [vmem:[#allocation7] sm:$0x3f] }
  0x81   :  { %2170 = vmatpush3.bf16.msra.mxu0 %v2167_v19  ;;  %v596_v19 = vrot.slane %v582_v3, %v2507_v13  ;;  %v666_v23 = vcombine.low %v565_v60, %v564_v1  ;;  %v667_v24 = vcombine.low %v573_v38, %v581_v4  ;;  %v1194_v25 = vrot.slane %v1180_v15, %v2507_v13  ;;  %v1746_v38 = vld [vmem:[#allocation8 + $0x38] sm:$0xff] }
  0x82   :  { %2172 = vmatprep.subr.bf16.mxu0 %v2616_v20  ;;  %v631_v26 = vcombine.low %v623_v8, %v630_v9  ;;  %v657_v27 = vrot.slane %v649_v0, %v2507_v13  ;;  %v664_v18 = vrot.slane %v650_v14, %v2507_v13  ;;  %v683_v28 = vcombine.low %v580_v17, %v589_v6 }
  0x83   :  { %v1195_v45 = vcombine.low %v1187_v16, %v1194_v25  ;;  %v684_v29 = vcombine.low %v597_v21, %v596_v19  ;;  %v648_v30 = vcombine.low %v640_v12, %v647_v22  ;;  %v674_v31 = vrot.slane %v666_v23, %v2507_v13 }
  0x84   :  { %v665_v32 = vcombine.low %v657_v27, %v664_v18  ;;  %v691_v33 = vrot.slane %v683_v28, %v2507_v13  ;;  %v2212_v40 = vpack.c.bf16 %v1740_v37, %v1739_v36  ;;  %v2402_v41 = vmov 0.0|0.0  }
  0x85   :  { %2174 = vmatpush3.bf16.msra.mxu0 %v2616_v20  ;;  %v681_v20 = vrot.slane %v667_v24, %v2507_v13  ;;  %2078 = vmatmul.mubr.f32.gmra.mrb[4].mxu1 %v1195_v45  ;;  %v698_v34 = vrot.slane %v684_v29, %v2507_v13  ;;  %v2215_v44 = vpack.c.bf16 %v1742_v43, %v1741_v42  ;;  %v2404_v58 = vmov 0.0  }
  0x86   :  { %2176 = vmatprep.subr.bf16.mxu0 %v2175_v7  ;;  %2211 = vmatprep.subr.bf16.mxu1 %v2402_v41  ;;  %v2218_v48 = vpack.c.bf16 %v1744_v47, %v1743_v46  ;;  %v2221_v50 = vpack.c.bf16 %v1746_v38, %v1745_v49  ;;  %v2224_v53 = vpack.c.bf16 %v1748_v52, %v1747_v51 }
  0x87   :  { %v682_v10 = vcombine.low %v674_v31, %v681_v20  ;;  %v699_v35 = vcombine.low %v691_v33, %v698_v34  ;;  %2213 = vmatpush3.bf16.msra.mxu1 %v2212_v40  ;;  %v2227_v56 = vpack.c.bf16 %v1750_v55, %v1749_v54  ;;  %v2230_v60 = vpack.c.bf16 %v1752_v59, %v1751_v57 }
  0x88   :  { %2214 = vmatprep.subr.bf16.mxu1 %v2402_v41  ;;  %2112 = vmatprep.mubr.msk.f32.mxu1 %vm2403_vm0, %v2404_v58  ;;  %v2233_v63 = vpack.c.bf16 %v1754_v62, %v1753_v61  ;;  %v1455_v9 = vcombine.high %v1453_v5, %v1453_v5  ;;  %v2658_v11 = vrot.slane %v1453_v5, %v2507_v13 }
  0x89   :  { %2178 = vmatpush3.bf16.msra.mxu0 %v2175_v7 }
  0x8a   :  { %v2677_v23 = vrot.slane %v1455_v9, %v2507_v13  ;;  %v2681_v24 = vcombine.high %v2658_v11, %v2658_v11 }
  0x8b   :  { %2216 = vmatpush3.bf16.msra.mxu1 %v2215_v44 }
  0x8c   :  { %2031 = vmatmul.mubr.f32.vlgmr.msra.gmra.mrb[0].mxu0 %v631_v26  ;;  %2217 = vmatprep.subr.bf16.mxu1 %v2402_v41 }
  0x8d   :  { %2033 = vmatprep.mubr.f32.mxu0 %v648_v30 }
  0x8f   :  { %2219 = vmatpush3.bf16.msra.mxu1 %v2218_v48 }
  0x90   :  { %2034 = vmatmul.mubr.f32.gmra.mrb[2].mxu0 %v665_v32  ;;  %2220 = vmatprep.subr.bf16.mxu1 %v2402_v41 }
  0x91   :  { %2036 = vmatprep.mubr.f32.mxu0 %v682_v10 }
  0x93   :  { %2222 = vmatpush3.bf16.msra.mxu1 %v2221_v50 }
  0x94   :  { %2037 = vmatmul.mubr.f32.gmra.mrb[4].mxu0 %v699_v35  ;;  %2223 = vmatprep.subr.bf16.mxu1 %v2402_v41 }
  0x97   :  { %2225 = vmatpush3.bf16.msra.mxu1 %v2224_v53 }
  0x98   :  { %2226 = vmatprep.subr.bf16.mxu1 %v2402_v41 }
  0x9b   :  { %2228 = vmatpush3.bf16.msra.mxu1 %v2227_v56 }
  0x9c   :  { %2229 = vmatprep.subr.bf16.mxu1 %v2402_v41 }
  0x9f   :  { %2231 = vmatpush3.bf16.msra.mxu1 %v2230_v60 }
  0xa0   :  { %2232 = vmatprep.subr.bf16.mxu1 %v2402_v41 }
  0xa3   :  { %2234 = vmatpush3.bf16.msra.mxu1 %v2233_v63 }
 0x142   :  { %v2073_v1 = vpop.f32.mrb[0].mxu1 }
 0x143   :  { %v1268_v2 = vpop.f32.mrb[1].mxu1  ;;  %v1320_v39 = vcombine.high %v2073_v1, %v2073_v1  ;;  %v1327_v12 = vrot.slane %v2073_v1, %v2507_v13 }
 0x144   :  { %v1303_v6 = vcombine.high %v1268_v2, %v1268_v2  ;;  %v1310_v15 = vrot.slane %v1268_v2, %v2507_v13 }
 0x145   :  { %v1334_v14 = vrot.slane %v1320_v39, %v2507_v13  ;;  %v1335_v27 = vcombine.high %v1327_v12, %v1327_v12 }
 0x146   :  { %v1317_v16 = vrot.slane %v1303_v6, %v2507_v13  ;;  %v1318_v28 = vcombine.high %v1310_v15, %v1310_v15 }
 0x147   :  { %v1336_v18 = vcombine.high %v1334_v14, %v1334_v14 }
 0x148   :  { %v1319_v31 = vcombine.high %v1317_v16, %v1317_v16 }
 0x14c   :  { %v2076_v3 = vpop.f32.mrb[2].mxu1 }
 0x14d   :  { %v1278_v4 = vpop.f32.mrb[3].mxu1  ;;  %v1354_v7 = vcombine.high %v2076_v3, %v2076_v3  ;;  %v2665_v0 = vrot.slane %v2076_v3, %v2507_v13 }
 0x14e   :  { %v1337_v8 = vcombine.high %v1278_v4, %v1278_v4  ;;  %v2668_v17 = vrot.slane %v1278_v4, %v2507_v13 }
 0x14f   :  { %v2671_v19 = vrot.slane %v1354_v7, %v2507_v13  ;;  %v1369_v20 = vcombine.high %v2665_v0, %v2665_v0 }
 0x150   :  { %v2674_v21 = vrot.slane %v1337_v8, %v2507_v13  ;;  %v1352_v32 = vcombine.high %v2668_v17, %v2668_v17 }
 0x151   :  { %v1370_v36 = vcombine.high %v2671_v19, %v2671_v19 }
 0x152   :  { %v1353_v37 = vcombine.high %v2674_v21, %v2674_v21 }
 0x158   :  { %v2079_v22 = vpop.f32.mrb[4].mxu1 }
 0x159   :  { %v1388_v25 = vcombine.high %v2079_v22, %v2079_v22  ;;  %v2684_v26 = vrot.slane %v2079_v22, %v2507_v13  ;;  %v1288_v45 = vpop.f32.mrb[5].mxu1 }
 0x15a   :  { %v1371_v29 = vcombine.high %v1288_v45, %v1288_v45  ;;  %v2702_v43 = vrot.slane %v1288_v45, %v2507_v13 }
 0x15b   :  { %v2691_v33 = vrot.slane %v1388_v25, %v2507_v13  ;;  %v1403_v42 = vcombine.high %v2684_v26, %v2684_v26 }
 0x15c   :  { %v2706_v48 = vrot.slane %v1371_v29, %v2507_v13 }
 0x15d   :  { %v1404_v52 = vcombine.high %v2691_v33, %v2691_v33 }
 0x15f   :  { %v2032_v30 = vpop.f32.mrb[0].mxu0 }
 0x160   :  { %v824_v34 = vcombine.high %v2032_v30, %v2032_v30  ;;  %v831_v10 = vrot.slane %v2032_v30, %v2507_v13  ;;  %v772_v35 = vpop.f32.mrb[1].mxu0 }
 0x161   :  { %v807_v40 = vcombine.high %v772_v35, %v772_v35  ;;  %v814_v41 = vrot.slane %v772_v35, %v2507_v13 }
 0x162   :  { %v838_v44 = vrot.slane %v824_v34, %v2507_v13  ;;  %v839_v46 = vcombine.high %v831_v10, %v831_v10  ;;  %v1433_v47 = vadd.f32 %v1327_v12, %v831_v10 }
 0x163   :  { %v821_v49 = vrot.slane %v807_v40, %v2507_v13  ;;  %v822_v38 = vcombine.high %v814_v41, %v814_v41  ;;  %v1429_v50 = vadd.f32 %v1310_v15, %v814_v41  ;;  %v2035_v51 = vpop.f32.mrb[2].mxu0 }
 0x164   :  { %v840_v53 = vcombine.high %v838_v44, %v838_v44  ;;  %v1434_v54 = vadd.f32 %v1335_v27, %v839_v46  ;;  %v1435_v55 = vadd.f32 %v1334_v14, %v838_v44  ;;  %v1478_v56 = vadd.f32 %v2681_v24, %v1433_v47  ;;  %v782_v57 = vpop.f32.mrb[3].mxu0 }
 0x165   :  { %v823_v59 = vcombine.high %v821_v49, %v821_v49  ;;  %v1430_v60 = vadd.f32 %v1318_v28, %v822_v38  ;;  %v1431_v58 = vadd.f32 %v1317_v16, %v821_v49  ;;  %v1474_v61 = vadd.f32 %v2658_v11, %v1429_v50 }
 0x166   :  { %v1436_v62 = vadd.f32 %v1336_v18, %v840_v53  ;;  %v1479_v63 = vadd.f32 %v2677_v23, %v1434_v54  ;;  %v1480_v1 = vadd.f32 %v2658_v11, %v1435_v55  ;;  %v1502_v2 = vmax.f32 %v1478_v56, 0.0 }
 0x167   :  { %v1432_v3 = vadd.f32 %v1319_v31, %v823_v59  ;;  %v1475_v4 = vadd.f32 %v2681_v24, %v1430_v60  ;;  %v1476_v39 = vadd.f32 %v2677_v23, %v1431_v58  ;;  %v1498_v5 = vmax.f32 %v1474_v61, 0.0  ;;  %v2717_v6 = vpop.f32.mrb[4].mxu0 }
 0x168   :  { %v1481_v7 = vadd.f32 %v2681_v24, %v1436_v62  ;;  %v1503_v8 = vmax.f32 %v1479_v63, 0.0  ;;  %v1504_v9 = vmax.f32 %v1480_v1, 0.0  ;;  %v858_v12 = vcombine.high %v2035_v51, %v2035_v51  ;;  %v2720_v14 = vpop.f32.mrb[5].mxu0 }
 0x169   :  { %v1477_v15 = vadd.f32 %v2658_v11, %v1432_v3  ;;  %v1499_v16 = vmax.f32 %v1475_v4, 0.0  ;;  %v1500_v22 = vmax.f32 %v1476_v39, 0.0  ;;  %v865_v25 = vrot.slane %v2035_v51, %v2507_v13 }
 0x16a   :  { %v1505_v45 = vmax.f32 %v1481_v7, 0.0  ;;  %v1576_v27 = vrot.slane %v1503_v8, %v2507_v13  ;;  %v872_v18 = vrot.slane %v858_v12, %v2507_v13  ;;  %v841_v28 = vcombine.high %v782_v57, %v782_v57 }
 0x16b   :  { %v1501_v29 = vmax.f32 %v1477_v15, 0.0  ;;  %v1546_v30 = vcombine.low %v1498_v5, %v1499_v16  ;;  %v1560_v31 = vrot.slane %v1500_v22, %v2507_v13  ;;  %v873_v34 = vcombine.high %v865_v25, %v865_v25 }
 0x16c   :  { %v1578_v10 = vcombine.low %v1504_v9, %v1505_v45  ;;  %v874_v35 = vcombine.high %v872_v18, %v872_v18  ;;  %v1441_v40 = vadd.f32 %v2665_v0, %v865_v25  ;;  %v1443_v41 = vadd.f32 %v2671_v19, %v872_v18 }
 0x16d   :  { %v1553_v44 = vrot.slane %v1546_v30, %v2507_v13  ;;  %v1562_v46 = vcombine.low %v1501_v29, %v1502_v2  ;;  %v1442_v47 = vadd.f32 %v1369_v20, %v873_v34  ;;  %v848_v49 = vrot.slane %v782_v57, %v2507_v13 }
 0x16e   :  { %v2734_v38 = vadd.f32 %v1370_v36, %v874_v35  ;;  %v1486_v50 = vadd.f32 %v2658_v11, %v1441_v40  ;;  %v1488_v51 = vadd.f32 %v2677_v23, %v1443_v41  ;;  %v855_v53 = vrot.slane %v841_v28, %v2507_v13 }
 0x16f   :  { %v1561_v54 = vcombine.low %v1553_v44, %v1560_v31  ;;  %v1569_v19 = vrot.slane %v1562_v46, %v2507_v13  ;;  %v1487_v55 = vadd.f32 %v2681_v24, %v1442_v47  ;;  %v856_v56 = vcombine.high %v848_v49, %v848_v49 }
 0x170   :  { %v1510_v59 = vmax.f32 %v1486_v50, 0.0  ;;  %v1512_v60 = vmax.f32 %v1488_v51, 0.0  ;;  %v857_v0 = vcombine.high %v855_v53, %v855_v53  ;;  %v1437_v20 = vadd.f32 %v2668_v17, %v848_v49 }
 0x171   :  { %v1577_v57 = vcombine.low %v1569_v19, %v1576_v27  ;;  %v1683_v36 = vsel %vm1682_vm1, %v1561_v54, -inf  ;;  %v1511_v58 = vmax.f32 %v1487_v55, 0.0  ;;  %v1438_v61 = vadd.f32 %v1352_v32, %v856_v56 }
 0x172   :  { %v1684_v62 = vrot.slane %v1683_v36, 4  ;;  %v1624_v63 = vrot.slane %v1512_v60, %v2507_v13  ;;  %v1439_v1 = vadd.f32 %v2674_v21, %v855_v53  ;;  %v1440_v2 = vadd.f32 %v1353_v37, %v857_v0 }
 0x173   :  { %v1690_v3 = vsel %vm1682_vm1, %v1577_v57, -inf  ;;  %v1610_v4 = vcombine.low %v1510_v59, %v1511_v58  ;;  %v1482_v39 = vadd.f32 %v2677_v23, %v1437_v20  ;;  %v1483_v5 = vadd.f32 %v2658_v11, %v1438_v61 }
 0x174   :  { %v1685_v7 = vmax.f32 %v1683_v36, %v1684_v62  ;;  %v1691_v8 = vrot.slane %v1690_v3, 4  ;;  %v1484_v17 = vadd.f32 %v2681_v24, %v1439_v1  ;;  %v1485_v32 = vadd.f32 %v2677_v23, %v1440_v2 }
 0x175   :  { %v1617_v9 = vrot.slane %v1610_v4, %v2507_v13  ;;  %v1506_v12 = vmax.f32 %v1482_v39, 0.0  ;;  %v1507_v15 = vmax.f32 %v1483_v5, 0.0  ;;  %v1585_v21 = vrot.slane %v1578_v10, %v2507_v13 }
 0x176   :  { %v1686_v37 = vrot.slane %v1685_v7, 2  ;;  %v1692_v16 = vmax.f32 %v1690_v3, %v1691_v8  ;;  %v1508_v22 = vmax.f32 %v1484_v17, 0.0  ;;  %v1509_v25 = vmax.f32 %v1485_v32, 0.0 }
 0x177   :  { %v1625_v45 = vcombine.low %v1617_v9, %v1624_v63  ;;  %v1592_v27 = vrot.slane %v1506_v12, %v2507_v13  ;;  %v892_v18 = vcombine.high %v2717_v6, %v2717_v6  ;;  %v899_v28 = vrot.slane %v2717_v6, %v2507_v13 }
 0x178   :  { %v1687_v29 = vmax.f32 %v1685_v7, %v1686_v37  ;;  %v1693_v30 = vrot.slane %v1692_v16, 2  ;;  %v1594_v31 = vcombine.low %v1507_v15, %v1508_v22  ;;  %v1608_v34 = vrot.slane %v1509_v25, %v2507_v13 }
 0x179   :  { %v1711_v10 = vsel %vm1682_vm1, %v1625_v45, -inf  ;;  %v1593_v35 = vcombine.low %v1585_v21, %v1592_v27  ;;  %v906_v40 = vrot.slane %v892_v18, %v2507_v13  ;;  %v907_v41 = vcombine.high %v899_v28, %v899_v28 }
 0x17a   :  { %v1688_v44 = vrot.slane %v1687_v29, 1  ;;  %v1694_v46 = vmax.f32 %v1692_v16, %v1693_v30  ;;  %v1712_v47 = vrot.slane %v1711_v10, 4  ;;  %v1601_v49 = vrot.slane %v1594_v31, %v2507_v13 }
 0x17b   :  { %v1697_v50 = vsel %vm1682_vm1, %v1593_v35, -inf  ;;  %v908_v51 = vcombine.high %v906_v40, %v906_v40  ;;  %v1449_v6 = vadd.f32 %v2684_v26, %v899_v28  ;;  %v1450_v53 = vadd.f32 %v1403_v42, %v907_v41 }
 0x17c   :  { %v1695_v54 = vrot.slane %v1694_v46, 1  ;;  %v1713_v19 = vmax.f32 %v1711_v10, %v1712_v47  ;;  %v1609_v55 = vcombine.low %v1601_v49, %v1608_v34  ;;  %v1386_v56 = vcombine.high %v2702_v43, %v2702_v43 }
 0x17d   :  { %v1698_v59 = vrot.slane %v1697_v50, 4  ;;  %v1451_v60 = vadd.f32 %v2691_v33, %v906_v40  ;;  %v1452_v0 = vadd.f32 %v1404_v52, %v908_v51  ;;  %v1387_v20 = vcombine.high %v2706_v48, %v2706_v48 }
 0x17e   :  { %v1689_v57 = vmax.f32 %v1687_v29, %v1688_v44  ;;  %v1714_v36 = vrot.slane %v1713_v19, 2  ;;  %v1704_v26 = vsel %vm1682_vm1, %v1609_v55, -inf  ;;  %v1495_v42 = vadd.f32 %v2658_v11, %v1450_v53 }
 0x17f   :  { %v1699_v58 = vmax.f32 %v1697_v50, %v1698_v59  ;;  %v1705_v61 = vrot.slane %v1704_v26, 4  ;;  %v1496_v62 = vadd.f32 %v2681_v24, %v1451_v60  ;;  %v1497_v63 = vadd.f32 %v2677_v23, %v1452_v0 }
 0x180   :  { %v1696_v1 = vmax.f32 %v1694_v46, %v1695_v54  ;;  %v1494_v33 = vadd.f32 %v2677_v23, %v1449_v6  ;;  %v1519_v52 = vmax.f32 %v1495_v42, 0.0  ;;  %v875_v2 = vcombine.high %v2720_v14, %v2720_v14 }
 0x181   :  { %v1700_v3 = vrot.slane %v1699_v58, 2  ;;  %v1706_v4 = vmax.f32 %v1704_v26, %v1705_v61  ;;  %v1520_v39 = vmax.f32 %v1496_v62, 0.0  ;;  %v1521_v5 = vmax.f32 %v1497_v63, 0.0 }
 0x182   :  { %v1715_v7 = vmax.f32 %v1713_v19, %v1714_v36  ;;  %v882_v8 = vrot.slane %v2720_v14, %v2507_v13  ;;  %v889_v17 = vrot.slane %v875_v2, %v2507_v13  ;;  %v1489_v32 = vadd.f32 %v2658_v11, %v2734_v38 }
 0x183   :  { %v1701_v9 = vmax.f32 %v1699_v58, %v1700_v3  ;;  %v1707_v12 = vrot.slane %v1706_v4, 2  ;;  %v1658_v15 = vcombine.low %v1519_v52, %v1520_v39  ;;  %v1672_v21 = vrot.slane %v1521_v5, %v2507_v13 }
 0x184   :  { %v890_v37 = vcombine.high %v882_v8, %v882_v8  ;;  %v891_v16 = vcombine.high %v889_v17, %v889_v17  ;;  %v1445_v22 = vadd.f32 %v2702_v43, %v882_v8  ;;  %v1447_v25 = vadd.f32 %v2706_v48, %v889_v17 }
 0x185   :  { %v1702_v45 = vrot.slane %v1701_v9, 1  ;;  %v1708_v27 = vmax.f32 %v1706_v4, %v1707_v12  ;;  %v1665_v14 = vrot.slane %v1658_v15, %v2507_v13  ;;  %v1513_v18 = vmax.f32 %v1489_v32, 0.0  ;;  %v1873_v12 = vld [vmem:[%s2829_s4] ss:$0 sm:$0xff] }
 0x186   :  { %v1446_v28 = vadd.f32 %v1386_v56, %v890_v37  ;;  %v1448_v29 = vadd.f32 %v1387_v20, %v891_v16  ;;  %v1490_v38 = vadd.f32 %v2681_v24, %v1445_v22  ;;  %v1492_v30 = vadd.f32 %v2658_v11, %v1447_v25 }
 0x187   :  { %v1703_v31 = vmax.f32 %v1701_v9, %v1702_v45  ;;  %v1518_v34 = vmax.f32 %v1494_v33, 0.0  ;;  %v1673_v10 = vcombine.low %v1665_v14, %v1672_v21  ;;  %v1709_v35 = vrot.slane %v1708_v27, 1 }
 0x188   :  { %v1491_v40 = vadd.f32 %v2677_v23, %v1446_v28  ;;  %v1493_v43 = vadd.f32 %v2681_v24, %v1448_v29  ;;  %v1514_v48 = vmax.f32 %v1490_v38, 0.0  ;;  %v1716_v41 = vrot.slane %v1715_v7, 1 }
 0x189   :  { %v1516_v44 = vmax.f32 %v1492_v30, 0.0  ;;  %v1710_v46 = vmax.f32 %v1708_v27, %v1709_v35  ;;  %v1732_v47 = vsel %vm1682_vm1, %v1673_v10, -inf  ;;  %v1771_v49 = vsel %vm1770_vm2, %v1696_v1, %v1689_v57 }
 0x18a   :  { %v1515_v50 = vmax.f32 %v1491_v40, 0.0  ;;  %v1517_v51 = vmax.f32 %v1493_v43, 0.0  ;;  %v1626_v6 = vcombine.low %v1513_v18, %v1514_v48  ;;  %v1733_v11 = vrot.slane %v1732_v47, 4 }
 0x18b   :  { %v1773_v53 = vsel %vm1772_vm3, %v1703_v31, %v1771_v49  ;;  %v1717_v19 = vmax.f32 %v1715_v7, %v1716_v41  ;;  %v1656_v55 = vrot.slane %v1518_v34, %v2507_v13 }
 0x18c   :  { %v1633_v54 = vrot.slane %v1626_v6, %v2507_v13  ;;  %v1640_v23 = vrot.slane %v1515_v50, %v2507_v13  ;;  %v1642_v24 = vcombine.low %v1516_v44, %v1517_v51  ;;  %v1775_v56 = vsel %vm1774_vm4, %v1710_v46, %v1773_v53 }
 0x18d   :  { %v1734_v0 = vmax.f32 %v1732_v47, %v1733_v11  ;;  %v1777_v20 = vsel %vm1776_vm5, %v1717_v19, %v1775_v56 }
 0x18e   :  { %v1641_v59 = vcombine.low %v1633_v54, %v1640_v23  ;;  %v1649_v60 = vrot.slane %v1642_v24, %v2507_v13 }
 0x18f   :  { %v1735_v58 = vrot.slane %v1734_v0, 2 }
 0x190   :  { %v1657_v57 = vcombine.low %v1649_v60, %v1656_v55  ;;  %v1718_v36 = vsel %vm1682_vm1, %v1641_v59, -inf }
 0x191   :  { %v1719_v26 = vrot.slane %v1718_v36, 4  ;;  %v1736_v33 = vmax.f32 %v1734_v0, %v1735_v58 }
 0x192   :  { %v1725_v42 = vsel %vm1682_vm1, %v1657_v57, -inf }
 0x193   :  { %v1720_v61 = vmax.f32 %v1718_v36, %v1719_v26  ;;  %v1726_v62 = vrot.slane %v1725_v42, 4  ;;  %v1737_v39 = vrot.slane %v1736_v33, 1 }
 0x195   :  { %v1721_v63 = vrot.slane %v1720_v61, 2  ;;  %v1727_v1 = vmax.f32 %v1725_v42, %v1726_v62  ;;  %v1738_v17 = vmax.f32 %v1736_v33, %v1737_v39 }
 0x197   :  { %v1722_v52 = vmax.f32 %v1720_v61, %v1721_v63  ;;  %v1728_v2 = vrot.slane %v1727_v1, 2 }
 0x199   :  { %v1723_v3 = vrot.slane %v1722_v52, 1  ;;  %v1729_v4 = vmax.f32 %v1727_v1, %v1728_v2 }
 0x19b   :  { %v1724_v13 = vmax.f32 %v1722_v52, %v1723_v3  ;;  %v1730_v5 = vrot.slane %v1729_v4, 1 }
 0x19d   :  { %v1731_v7 = vmax.f32 %v1729_v4, %v1730_v5  ;;  %v1779_v8 = vsel %vm1778_vm6, %v1724_v13, %v1777_v20 }
 0x19f   :  { %v1781_v32 = vsel %vm1780_vm7, %v1731_v7, %v1779_v8 }
 0x1a0   :  { %v1783_v9 = vsel %vm1782_vm8, %v1738_v17, %v1781_v32 }
 0x1a1   :  { %2113 = vmatmul.mubr.f32.vlgmr.msra.gmra.mrb[6].mxu1 %v1783_v9 }
 0x274   :  { %v1851_v15 = vpop.f32.mrb[6].mxu1 }
 0x275   :  { %v1852_v21 = vadd.f32 %v1873_v12, %v1851_v15  ;;  %v2114_v37 = vpop.f32.mrb[7].mxu1 }
 0x277   :  { %1855 = vst [vmem:[#allocation10] sm:$0xff] %v1852_v21 }
 0x278   :  { %2376 = shalt.err (!%p2373_p8)
}
 0x279   :  { %s2377_s20 = scalar_lea.hbm %s2830_s5, 128 }
 0x27a   :  { %p2378_p9 = scmp.ne.s32.totalorder %s2830_s5, %s2377_s20  ;;  %p2381_p10 = scmp.lt.u32.totalorder %s2377_s20, %s2830_s5 }
 0x27c   :  { %p2383_p11 = pnand %p2381_p10, %p2378_p9 }
 0x27e   :  { %2386 = shalt.err (!%p2383_p11)
}
 0x27f   :  { %1865 = dma.vmem_to_hbm [thread:$0]  %s1863_s1, 128, %s2830_s5, [#allocation4]  }
 0x280   :  { %2393 = dma.done.wait [#allocation4], 128  }
 0x281   :  { %2394 = vsyncadd [#allocation4], 4294967168 }
 0x282   :  { %1869 = vsyncpa [#allocation3], 1 }
 0x283   :  { %1870 = vsyncpa [#allocation6], 1 }
 0x284   :  { %1871 = vsyncpa [#allocation9], 1 }
 0x285   :  { %1872 = vsyncpa [#allocation4], 1 }

</bundles_post_ra>
